<compile_context>
chip_gen: v5e
topology: v5e:2x2
jax: 0.10.0
libtpu: 0.0.40
codegen_flags: <defaults>
</compile_context>

<pallas_src>
import functools

import jax
import jax.numpy as jnp
from jax.experimental import pallas as pl
from jax.experimental.pallas import tpu as pltpu


# ----------------------------- tiling helpers ---------------------------------------


def _vmem_capacity_bytes():
    try:
        return int(pltpu.get_tpu_info().vmem_capacity_bytes)
    except Exception:
        return 64 << 20  # conservative default (v7x per-TC VMEM)


def _tile_budget_and_vmem_limit():
    """Generation-aware per-input tile budget (f32-equivalent bytes) + scoped-VMEM limit."""
    vmem = _vmem_capacity_bytes()
    vmem_limit = min(vmem * 3 // 4, 96 << 20)     # ~48 MiB on v7x, 96 MiB on v5e/v6e
    tile_budget = min(4 << 20, vmem_limit // 12)  # 3 inputs x 2 buffers + f32-temp headroom
    return tile_budget, vmem_limit


def _row_packing(dtype):
    # sublanes per vreg: f32 -> 8, bf16/f16 -> 16, int8/bool -> 32
    return 8 * (4 // jnp.dtype(dtype).itemsize)


def _pick_tile_rows(R, L, row_align, max_tile_bytes):
    """Largest divisor of R that is a multiple of row_align (or == R) with f32 tile <= budget."""
    def bytes_f32(r):
        return r * L * 4

    best = None
    for d in range(1, R + 1):
        if R % d:
            continue
        if d != R and d % row_align:
            continue
        if bytes_f32(d) > max_tile_bytes:
            continue
        best = d
    if best is not None:
        return best
    # Nothing at the preferred alignment fits the budget: relax to the hard sublane-8
    # requirement, largest that still fits; if even that fails, smallest legal divisor.
    div8 = [d for d in range(1, R + 1) if R % d == 0 and (d % 8 == 0 or d == R)]
    fits = [d for d in div8 if bytes_f32(d) <= max_tile_bytes]
    return max(fits) if fits else min(div8)


def _canonicalize(x):
    """(B, C, H, W) -> lane-dense (B, R, L) view (free row-major reshape, no data movement)."""
    B, C, H, W = x.shape
    if W % 128 == 0:
        return x.reshape(B, C * H, W)
    n = C * H * W
    if n % 128 == 0:
        return x.reshape(B, n // 128, 128)
    # TODO(synk): pad the flattened axis up to a multiple of 128 for fully lane-dense
    # streaming when C*H*W is not lane-aligned; current layout is correct, just wastes lanes.
    return x.reshape(B, C * H, W)


# ----------------------------- kernels ------------------------------------------------


def _mse_masked_kernel(pred_ref, tgt_ref, mask_ref, out_ref, num_acc, den_acc, *, vmin, vmax):
    step = pl.program_id(1)

    @pl.when(step == 0)
    def _():
        num_acc[...] = jnp.zeros_like(num_acc)
        den_acc[...] = jnp.zeros_like(den_acc)

    _, TR, L = pred_ref.shape
    p = jnp.clip(pred_ref[...].astype(jnp.float32), vmin, vmax)
    t = jnp.clip(tgt_ref[...].astype(jnp.float32), vmin, vmax)
    d = p - t
    m = mask_ref[...]
    if m.dtype == jnp.bool_:
        sq = jnp.where(m, d * d, 0.0)     # select instead of cast+mul (saves VPU ops)
        cnt = jnp.where(m, 1.0, 0.0)
    else:
        # non-boolean mask: keep exact multiply-by-mask-value semantics of the reference
        mf = m.astype(jnp.float32)
        sq = d * d * mf
        cnt = mf

    if TR % 8 == 0:
        # vreg-shaped partial accumulation: pure VPU elementwise adds per step,
        # no cross-lane reduction and no scalar loop-carried dependency.
        num_acc[...] += jnp.sum(sq.reshape(TR // 8, 8, L), axis=0)
        den_acc[...] += jnp.sum(cnt.reshape(TR // 8, 8, L), axis=0)
    else:
        # rare: full-extent tile whose row count is not a multiple of 8
        num_acc[0:1, :] = num_acc[0:1, :] + jnp.sum(sq.reshape(TR, L), axis=0, keepdims=True)
        den_acc[0:1, :] = den_acc[0:1, :] + jnp.sum(cnt.reshape(TR, L), axis=0, keepdims=True)

    @pl.when(step == pl.num_programs(1) - 1)
    def _():
        # NOTE: den == 0 (all-invalid mask) yields NaN/Inf for this batch, matching the
        # PyTorch reference (it poisons the final mean there too).
        out_ref[...] = (jnp.sum(num_acc[...]) / jnp.sum(den_acc[...])).reshape(1, 1, 1)


def _mse_nomask_kernel(pred_ref, tgt_ref, out_ref, num_acc, *, vmin, vmax, inv_den):
    step = pl.program_id(1)

    @pl.when(step == 0)
    def _():
        num_acc[...] = jnp.zeros_like(num_acc)

    _, TR, L = pred_ref.shape
    p = jnp.clip(pred_ref[...].astype(jnp.float32), vmin, vmax)
    t = jnp.clip(tgt_ref[...].astype(jnp.float32), vmin, vmax)
    d = p - t
    sq = d * d

    if TR % 8 == 0:
        num_acc[...] += jnp.sum(sq.reshape(TR // 8, 8, L), axis=0)
    else:
        num_acc[0:1, :] = num_acc[0:1, :] + jnp.sum(sq.reshape(TR, L), axis=0, keepdims=True)

    @pl.when(step == pl.num_programs(1) - 1)
    def _():
        out_ref[...] = (jnp.sum(num_acc[...]) * jnp.float32(inv_den)).reshape(1, 1, 1)


# ----------------------------- pallas_call wrappers -----------------------------------


def _per_batch_mse_masked(pred, target, mask, vmin, vmax, max_tile_bytes=None):
    pred3, tgt3, mask3 = _canonicalize(pred), _canonicalize(target), _canonicalize(mask)
    B, R, L = pred3.shape

    budget, vmem_limit = _tile_budget_and_vmem_limit()
    if max_tile_bytes is not None:
        budget = max_tile_bytes
    row_align = max(_row_packing(pred.dtype), _row_packing(target.dtype),
                    _row_packing(mask.dtype))
    tr = _pick_tile_rows(R, L, row_align, budget)
    nr = R // tr

    kernel = functools.partial(_mse_masked_kernel, vmin=float(vmin), vmax=float(vmax))
    in_blk = pl.BlockSpec((1, tr, L), lambda b, s: (b, s, 0))
    bytes_accessed = (pred3.size * pred3.dtype.itemsize
                      + tgt3.size * tgt3.dtype.itemsize
                      + mask3.size * mask3.dtype.itemsize + B * 4)

    out = pl.pallas_call(
        kernel,
        out_shape=jax.ShapeDtypeStruct((B, 1, 1), jnp.float32),
        grid=(B, nr),
        in_specs=[in_blk, in_blk, in_blk],
        out_specs=pl.BlockSpec((1, 1, 1), lambda b, s: (b, 0, 0)),
        scratch_shapes=[pltpu.VMEM((8, L), jnp.float32),
                        pltpu.VMEM((8, L), jnp.float32)],
        compiler_params=pltpu.CompilerParams(
            dimension_semantics=("parallel", "arbitrary"),
            vmem_limit_bytes=int(vmem_limit)),
        cost_estimate=pl.CostEstimate(
            flops=int(10 * pred3.size), transcendentals=0,
            bytes_accessed=int(bytes_accessed)),
    )(pred3, tgt3, mask3)
    return out[:, 0, 0]


def _per_batch_mse_nomask(pred, target, vmin, vmax, max_tile_bytes=None):
    pred3, tgt3 = _canonicalize(pred), _canonicalize(target)
    B, R, L = pred3.shape

    budget, vmem_limit = _tile_budget_and_vmem_limit()
    if max_tile_bytes is not None:
        budget = max_tile_bytes
    row_align = max(_row_packing(pred.dtype), _row_packing(target.dtype))
    tr = _pick_tile_rows(R, L, row_align, budget)
    nr = R // tr

    kernel = functools.partial(_mse_nomask_kernel, vmin=float(vmin), vmax=float(vmax),
                               inv_den=1.0 / float(R * L))
    in_blk = pl.BlockSpec((1, tr, L), lambda b, s: (b, s, 0))
    bytes_accessed = (pred3.size * pred3.dtype.itemsize
                      + tgt3.size * tgt3.dtype.itemsize + B * 4)

    out = pl.pallas_call(
        kernel,
        out_shape=jax.ShapeDtypeStruct((B, 1, 1), jnp.float32),
        grid=(B, nr),
        in_specs=[in_blk, in_blk],
        out_specs=pl.BlockSpec((1, 1, 1), lambda b, s: (b, 0, 0)),
        scratch_shapes=[pltpu.VMEM((8, L), jnp.float32)],
        compiler_params=pltpu.CompilerParams(
            dimension_semantics=("parallel", "arbitrary"),
            vmem_limit_bytes=int(vmem_limit)),
        cost_estimate=pl.CostEstimate(
            flops=int(8 * pred3.size), transcendentals=0,
            bytes_accessed=int(bytes_accessed)),
    )(pred3, tgt3)
    return out[:, 0, 0]


# ----------------------------- module wrapper ------------------------------------------


class MSE:
    """JAX/Pallas port of the PyTorch MSE metric module (same forward semantics)."""

    def __init__(self, branch='src_depth', target='src_depth', min=0, max=10.0):
        self.branch = branch
        self.target = target
        self.min = min
        self.max = max

    def __call__(self, _output, _input):
        if self.branch not in _output:
            return jnp.array(0, dtype=jnp.float32)

        pred = _output[self.branch]       # native dtype (e.g. bf16) — kernel upcasts per tile
        target = _input[self.target]

        B = _input['src_rgb'].shape[0]    # B from src_rgb, as in the reference module
        assert pred.shape[0] == B and target.shape == pred.shape, (pred.shape, target.shape, B)

        if 'src_valid' in _input:
            mask = _input['src_valid']    # bool/int8 streamed as-is (no host f32 cast)
            assert mask.shape == pred.shape, (mask.shape, pred.shape)
            per_batch = _per_batch_mse_masked(pred, target, mask, self.min, self.max)
        else:
            # mask = ones_like(src_depth): dedicated no-mask kernel (static denominator).
            assert _input['src_depth'].shape == pred.shape
            per_batch = _per_batch_mse_nomask(pred, target, self.min, self.max)

        return jnp.sum(per_batch) / jnp.float32(B)


# ----------------------------- verification --------------------------------------------


def _reference(pred, target, mask, vmin, vmax):
    """Pure-JAX reference for verification (upcasts like the kernel does)."""
    p = jnp.clip(pred.astype(jnp.float32), vmin, vmax)
    t = jnp.clip(target.astype(jnp.float32), vmin, vmax)
    m = mask.astype(jnp.float32)
    B = pred.shape[0]
    per_b = jnp.sum((p - t) ** 2 * m, axis=(1, 2, 3)) / jnp.sum(m, axis=(1, 2, 3))
    return jnp.sum(per_b) / B


if __name__ == "__main__":
    key = jax.random.PRNGKey(0)
    k1, k2, k3, k4, k5, k6, k7 = jax.random.split(key, 7)

    metric = MSE(branch='src_depth', target='src_depth', min=0, max=10.0)

    # --- case 1: masked path, f32 depth maps, bool validity mask ---
    B, C, H, W = 2, 1, 16, 128
    rgb = jax.random.normal(k1, (B, 3, H, W), dtype=jnp.float32)
    gt_depth = jax.random.uniform(k2, (B, C, H, W), minval=-1.0, maxval=12.0, dtype=jnp.float32)
    pred_depth = jax.random.uniform(k3, (B, C, H, W), minval=-1.0, maxval=12.0, dtype=jnp.float32)
    valid = jax.random.uniform(k4, (B, C, H, W)) > 0.3

    _output = {'src_depth': pred_depth}
    _input = {'src_depth': gt_depth, 'src_rgb': rgb, 'src_valid': valid}
    loss = jax.block_until_ready(metric(_output, _input))
    ref = _reference(pred_depth, gt_depth, valid, 0.0, 10.0)
    assert jnp.allclose(loss, ref, rtol=1e-5, atol=1e-5), (loss, ref)

    # --- case 2: 'src_valid' absent -> all-ones mask via the dedicated no-mask kernel ---
    _input_nomask = {'src_depth': gt_depth, 'src_rgb': rgb}
    loss_nm = jax.block_until_ready(metric(_output, _input_nomask))
    ref_nm = _reference(pred_depth, gt_depth, jnp.ones_like(gt_depth, dtype=jnp.bool_), 0.0, 10.0)
    assert jnp.allclose(loss_nm, ref_nm, rtol=1e-5, atol=1e-5), (loss_nm, ref_nm)

    # --- case 3: bf16 predictions + forced tiling (TR < R, multi-step accumulation) ---
    B3, C3, H3, W3 = 2, 1, 128, 128
    kk = jax.random.split(k5, 3)
    gt3 = jax.random.uniform(kk[0], (B3, C3, H3, W3), minval=-1.0, maxval=12.0, dtype=jnp.float32)
    pr3 = jax.random.uniform(kk[1], (B3, C3, H3, W3), minval=-1.0, maxval=12.0,
                             dtype=jnp.float32).astype(jnp.bfloat16)
    valid3 = jax.random.uniform(kk[2], (B3, C3, H3, W3)) > 0.3
    per_b3 = _per_batch_mse_masked(pr3, gt3, valid3, 0.0, 10.0,
                                   max_tile_bytes=16 * 1024)  # forces TR=32 -> 4 spatial steps
    loss3 = jax.block_until_ready(jnp.sum(per_b3) / B3)
    ref3 = _reference(pr3, gt3, valid3, 0.0, 10.0)
    assert jnp.allclose(loss3, ref3, rtol=1e-4, atol=1e-4), (loss3, ref3)

    # --- case 4: W not a multiple of 128 -> flattened lane-dense (B, N/128, 128) layout ---
    B4, C4, H4, W4 = 2, 4, 16, 96
    kk4 = jax.random.split(k6, 3)
    gt4 = jax.random.uniform(kk4[0], (B4, C4, H4, W4), minval=-1.0, maxval=12.0, dtype=jnp.float32)
    pr4 = jax.random.uniform(kk4[1], (B4, C4, H4, W4), minval=-1.0, maxval=12.0, dtype=jnp.float32)
    valid4 = jax.random.uniform(kk4[2], (B4, C4, H4, W4)) > 0.3
    per_b4 = _per_batch_mse_masked(pr4, gt4, valid4, 0.0, 10.0)
    loss4 = jax.block_until_ready(jnp.sum(per_b4) / B4)
    ref4 = _reference(pr4, gt4, valid4, 0.0, 10.0)
    assert jnp.allclose(loss4, ref4, rtol=1e-5, atol=1e-5), (loss4, ref4)

    # --- case 5: row count not a multiple of 8 -> scalar-row fallback accumulation ---
    B5, C5, H5, W5 = 2, 1, 4, 128
    kk5 = jax.random.split(k7, 3)
    gt5 = jax.random.uniform(kk5[0], (B5, C5, H5, W5), minval=-1.0, maxval=12.0, dtype=jnp.float32)
    pr5 = jax.random.uniform(kk5[1], (B5, C5, H5, W5), minval=-1.0, maxval=12.0, dtype=jnp.float32)
    valid5 = jax.random.uniform(kk5[2], (B5, C5, H5, W5)) > 0.3
    per_b5 = _per_batch_mse_masked(pr5, gt5, valid5, 0.0, 10.0)
    loss5 = jax.block_until_ready(jnp.sum(per_b5) / B5)
    ref5 = _reference(pr5, gt5, valid5, 0.0, 10.0)
    assert jnp.allclose(loss5, ref5, rtol=1e-5, atol=1e-5), (loss5, ref5)

    # --- case 6: missing branch returns 0.0, as in the PyTorch module ---
    zero = metric({}, _input)
    assert float(zero) == 0.0

    print("KERNEL_OK")
</pallas_src>

<mosaic_0001>
module attributes {stable_mosaic.version = 11 : i64} {
  func.func @_mse_masked_kernel(%arg0: i32, %arg1: i32, %arg2: memref<1x16x128xf32, #tpu.memory_space<vmem>>, %arg3: memref<1x16x128xf32, #tpu.memory_space<vmem>>, %arg4: memref<1x16x128xi32, #tpu.memory_space<vmem>>, %arg5: memref<1x1x1xf32, #tpu.memory_space<vmem>>, %arg6: memref<8x128xf32, #tpu.memory_space<vmem>>, %arg7: memref<8x128xf32, #tpu.memory_space<vmem>>) attributes {dimension_semantics = [#tpu.dimension_semantics<parallel>, #tpu.dimension_semantics<arbitrary>], iteration_bounds = array<i64: 2, 1>, scalar_prefetch = 0 : i64, scratch_operands = 2 : i64, tpu.core_type = #tpu.core_type<tc>, window_params = [{transform_indices = @transform_0, window_bounds = array<i64: 1, 16, 128>}, {transform_indices = @transform_1, window_bounds = array<i64: 1, 16, 128>}, {transform_indices = @transform_2, window_bounds = array<i64: 1, 16, 128>}, {transform_indices = @transform_3, window_bounds = array<i64: 1, 1, 1>}]} {
    %c0_i32 = arith.constant 0 : i32
    %0 = arith.cmpi eq, %arg1, %c0_i32 : i32
    %1 = arith.extui %0 : i1 to i32
    %c0_i32_0 = arith.constant 0 : i32
    %2 = arith.cmpi ne, %1, %c0_i32_0 : i32
    scf.if %2 {
      %cst_28 = arith.constant 0.000000e+00 : f32
      %35 = vector.broadcast %cst_28 : f32 to vector<8x128xf32>
      %c0_29 = arith.constant 0 : index
      %c0_30 = arith.constant 0 : index
      %36 = vector.load %arg6[%c0_29, %c0_30] : memref<8x128xf32, #tpu.memory_space<vmem>>, vector<8x128xf32>
      tpu.vector_store %arg6[%c0_29, %c0_30], %35 {strides = array<i32>} : memref<8x128xf32, #tpu.memory_space<vmem>>, vector<8x128xf32>,
      %cst_31 = arith.constant 0.000000e+00 : f32
      %37 = vector.broadcast %cst_31 : f32 to vector<8x128xf32>
      %c0_32 = arith.constant 0 : index
      %c0_33 = arith.constant 0 : index
      %38 = vector.load %arg7[%c0_32, %c0_33] : memref<8x128xf32, #tpu.memory_space<vmem>>, vector<8x128xf32>
      tpu.vector_store %arg7[%c0_32, %c0_33], %37 {strides = array<i32>} : memref<8x128xf32, #tpu.memory_space<vmem>>, vector<8x128xf32>,
    } else {
    }
    %c0 = arith.constant 0 : index
    %c0_1 = arith.constant 0 : index
    %c0_2 = arith.constant 0 : index
    %3 = vector.load %arg2[%c0, %c0_1, %c0_2] : memref<1x16x128xf32, #tpu.memory_space<vmem>>, vector<1x16x128xf32>
    %cst = arith.constant 0.000000e+00 : f32
    %cst_3 = arith.constant 1.000000e+01 : f32
    %4 = vector.broadcast %cst : f32 to vector<1x16x128xf32>
    %5 = arith.maximumf %4, %3 : vector<1x16x128xf32>
    %6 = vector.broadcast %cst_3 : f32 to vector<1x16x128xf32>
    %7 = arith.minimumf %6, %5 : vector<1x16x128xf32>
    %c0_4 = arith.constant 0 : index
    %c0_5 = arith.constant 0 : index
    %c0_6 = arith.constant 0 : index
    %8 = vector.load %arg3[%c0_4, %c0_5, %c0_6] : memref<1x16x128xf32, #tpu.memory_space<vmem>>, vector<1x16x128xf32>
    %cst_7 = arith.constant 0.000000e+00 : f32
    %cst_8 = arith.constant 1.000000e+01 : f32
    %9 = vector.broadcast %cst_7 : f32 to vector<1x16x128xf32>
    %10 = arith.maximumf %9, %8 : vector<1x16x128xf32>
    %11 = vector.broadcast %cst_8 : f32 to vector<1x16x128xf32>
    %12 = arith.minimumf %11, %10 : vector<1x16x128xf32>
    %13 = arith.subf %7, %12 : vector<1x16x128xf32>
    %c0_9 = arith.constant 0 : index
    %c0_10 = arith.constant 0 : index
    %c0_11 = arith.constant 0 : index
    %14 = vector.load %arg4[%c0_9, %c0_10, %c0_11] : memref<1x16x128xi32, #tpu.memory_space<vmem>>, vector<1x16x128xi32>
    %cst_12 = arith.constant dense<0> : vector<1x16x128xi32>
    %15 = arith.cmpi ne, %14, %cst_12 : vector<1x16x128xi32>
    %16 = arith.mulf %13, %13 : vector<1x16x128xf32>
    %cst_13 = arith.constant 0.000000e+00 : f32
    %17 = vector.broadcast %cst_13 : f32 to vector<1x16x128xf32>
    %18 = arith.select %15, %16, %17 : vector<1x16x128xi1>, vector<1x16x128xf32>
    %cst_14 = arith.constant 1.000000e+00 : f32
    %cst_15 = arith.constant 0.000000e+00 : f32
    %19 = vector.broadcast %cst_14 : f32 to vector<1x16x128xf32>
    %20 = vector.broadcast %cst_15 : f32 to vector<1x16x128xf32>
    %21 = arith.select %15, %19, %20 : vector<1x16x128xi1>, vector<1x16x128xf32>
    %c0_16 = arith.constant 0 : index
    %c0_17 = arith.constant 0 : index
    %22 = vector.load %arg6[%c0_16, %c0_17] : memref<8x128xf32, #tpu.memory_space<vmem>>, vector<8x128xf32>
    %23 = vector.shape_cast %18 : vector<1x16x128xf32> to vector<2x8x128xf32>
    %cst_18 = arith.constant dense<0.000000e+00> : vector<8x128xf32>
    %24 = vector.multi_reduction <add>, %23, %cst_18 [0] : vector<2x8x128xf32> to vector<8x128xf32>
    %25 = arith.addf %22, %24 : vector<8x128xf32>
    %c0_19 = arith.constant 0 : index
    %c0_20 = arith.constant 0 : index
    %26 = vector.load %arg6[%c0_19, %c0_20] : memref<8x128xf32, #tpu.memory_space<vmem>>, vector<8x128xf32>
    tpu.vector_store %arg6[%c0_19, %c0_20], %25 {strides = array<i32>} : memref<8x128xf32, #tpu.memory_space<vmem>>, vector<8x128xf32>,
    %c0_21 = arith.constant 0 : index
    %c0_22 = arith.constant 0 : index
    %27 = vector.load %arg7[%c0_21, %c0_22] : memref<8x128xf32, #tpu.memory_space<vmem>>, vector<8x128xf32>
    %28 = vector.shape_cast %21 : vector<1x16x128xf32> to vector<2x8x128xf32>
    %cst_23 = arith.constant dense<0.000000e+00> : vector<8x128xf32>
    %29 = vector.multi_reduction <add>, %28, %cst_23 [0] : vector<2x8x128xf32> to vector<8x128xf32>
    %30 = arith.addf %27, %29 : vector<8x128xf32>
    %c0_24 = arith.constant 0 : index
    %c0_25 = arith.constant 0 : index
    %31 = vector.load %arg7[%c0_24, %c0_25] : memref<8x128xf32, #tpu.memory_space<vmem>>, vector<8x128xf32>
    tpu.vector_store %arg7[%c0_24, %c0_25], %30 {strides = array<i32>} : memref<8x128xf32, #tpu.memory_space<vmem>>, vector<8x128xf32>,
    %c0_i32_26 = arith.constant 0 : i32
    %32 = arith.cmpi eq, %arg1, %c0_i32_26 : i32
    %33 = arith.extui %32 : i1 to i32
    %c0_i32_27 = arith.constant 0 : i32
    %34 = arith.cmpi ne, %33, %c0_i32_27 : i32
    scf.if %34 {
      %c0_28 = arith.constant 0 : index
      %c0_29 = arith.constant 0 : index
      %35 = vector.load %arg6[%c0_28, %c0_29] : memref<8x128xf32, #tpu.memory_space<vmem>>, vector<8x128xf32>
      %36 = vector.shape_cast %35 : vector<8x128xf32> to vector<1x8x128xf32>
      %cst_30 = arith.constant dense<0.000000e+00> : vector<1xf32>
      %37 = vector.multi_reduction <add>, %36, %cst_30 [1, 2] : vector<1x8x128xf32> to vector<1xf32>
      %38 = vector.shape_cast %37 : vector<1xf32> to vector<1x1x1xf32>
      %39 = vector.extract %38[0, 0, 0] : f32 from vector<1x1x1xf32>
      %c0_31 = arith.constant 0 : index
      %c0_32 = arith.constant 0 : index
      %40 = vector.load %arg7[%c0_31, %c0_32] : memref<8x128xf32, #tpu.memory_space<vmem>>, vector<8x128xf32>
      %41 = vector.shape_cast %40 : vector<8x128xf32> to vector<1x8x128xf32>
      %cst_33 = arith.constant dense<0.000000e+00> : vector<1xf32>
      %42 = vector.multi_reduction <add>, %41, %cst_33 [1, 2] : vector<1x8x128xf32> to vector<1xf32>
      %43 = vector.shape_cast %42 : vector<1xf32> to vector<1x1x1xf32>
      %44 = vector.extract %43[0, 0, 0] : f32 from vector<1x1x1xf32>
      %45 = arith.divf %39, %44 : f32
      %46 = vector.broadcast %45 : f32 to vector<1x1x1xf32>
      %c0_34 = arith.constant 0 : index
      %c0_35 = arith.constant 0 : index
      %c0_36 = arith.constant 0 : index
      %47 = vector.load %arg5[%c0_34, %c0_35, %c0_36] : memref<1x1x1xf32, #tpu.memory_space<vmem>>, vector<1x1x1xf32>
      tpu.vector_store %arg5[%c0_34, %c0_35, %c0_36], %46 {strides = array<i32>} : memref<1x1x1xf32, #tpu.memory_space<vmem>>, vector<1x1x1xf32>,
    } else {
    }
    return
  }
  func.func @transform_0(%arg0: i32, %arg1: i32) -> (i32, i32, i32) {
    %c0_i32 = arith.constant 0 : i32
    %c0_i32_0 = arith.constant 0 : i32
    return %arg0, %arg1, %c0_i32 : i32, i32, i32
  }
  func.func @transform_1(%arg0: i32, %arg1: i32) -> (i32, i32, i32) {
    %c0_i32 = arith.constant 0 : i32
    %c0_i32_0 = arith.constant 0 : i32
    return %arg0, %arg1, %c0_i32 : i32, i32, i32
  }
  func.func @transform_2(%arg0: i32, %arg1: i32) -> (i32, i32, i32) {
    %c0_i32 = arith.constant 0 : i32
    %c0_i32_0 = arith.constant 0 : i32
    return %arg0, %arg1, %c0_i32 : i32, i32, i32
  }
  func.func @transform_3(%arg0: i32, %arg1: i32) -> (i32, i32, i32) {
    %c0_i32 = arith.constant 0 : i32
    %c0_i32_0 = arith.constant 0 : i32
    %c0_i32_1 = arith.constant 0 : i32
    return %arg0, %c0_i32, %c0_i32_0 : i32, i32, i32
  }
}

</mosaic_0001>

<bundles_post_ra>
// kernel: tpu_custom_call.1
= control target key start
LH: loop header
LB: loop body
LE: loop exit
PB: predicated region body
PF: predicated region fallthrough
CT: control target
= control target key end

     0   :  { %8 = vsyncpa [#allocation5], 0  ;;  %s752_s0 = inlined_call_operand.vmem [shape: f32[2,16,128], index: 0, kind: input, shape index: {}]   ;;  %s753_s1 = inlined_call_operand.hbm [shape: f32[2,16,128], index: 1, kind: input, shape index: {}]   ;;  %s754_s2 = inlined_call_operand.vmem [shape: s32[2,16,128], index: 2, kind: input, shape index: {}]   ;;  %s755_s3 = inlined_call_operand.vmem [shape: f32[2,1,1], index: 3, kind: output, shape index: {}]  }
   0x1   :  { %10 = vsyncpa [#allocation5 + $0x1], 0  ;;  %s654_s12 = smov 0   ;;  %s656_s13 = smov 0  }
   0x2   :  { %s658_s14 = smov 0   ;;  %s660_s15 = smov 0  }
   0x3   :  { %s662_s16 = smov 0   ;;  %s664_s17 = smov 0  }
   0x4 LB: > { %s465_s18 = sadd.s32 4294967295, %s629_s17   ;;  %s28_s19 = sadd.s32 1, %s625_s16  ;;  %s629_s17 = sphi %s664_s17, %s16_s17   ;;  %s625_s16 = sphi %s662_s16, %s762_s16   ;;  %s621_s15 = sphi %s660_s15, %s761_s15   ;;  %s617_s14 = sphi %s658_s14, %s760_s14   ;;  %s613_s13 = sphi %s656_s13, %s759_s13   ;;  %s609_s12 = sphi %s654_s12, %s758_s12  }
   0x5   : > { %p30_p0 = scmp.ge.s32.totalorder %s28_s19, 2  ;;  %s65_s20 = sadd.s32 1, %s617_s14 }
   0x6   : > { %p72_p1 = scmp.ne.s32.totalorder %s617_s14, %s613_s13  ;;  %p73_p2 = scmp.eq.s32.totalorder %s629_s17, 0 }
   0x7   : > { %s764_s19 = smov (%p30_p0, %s28_s19), 0  ;;  %p78_p4 = scmp.ne.s32.totalorder %s613_s13, %s609_s12 }
   0x8   : > { %p690_p3 = por %p73_p2, %p72_p1  ;;  %s60_s22 = ssub.s32 %s625_s16, %s764_s19 }
   0x9   : > { %p79_p5 = scmp.eq.s32.totalorder %s465_s18, 0  ;;  %p63_p6 = scmp.eq.s32.totalorder %s60_s22, 0 }
   0xa   : > { %p495_p8 = scmp.lt.s32.totalorder %s629_s17, 2  ;;  %s169_s25 = sand.u32 1, %s617_s14  }
   0xb   : > { %p697_p7 = por %p79_p5, %p78_p4  ;;  %s480_s26 = sshll.u32 %s625_s16, 4 }
   0xc   : > { %s703_s24 = scalar_select %p63_p6, %s617_s14, %s65_s20  }
   0xd   : > { %s469_s27 = sshll.u32 %s169_s25, 4  ;;  %s180_s30 = scalar_lea.hbm %s753_s1, %s480_s26 }
   0xe   : > { %s181_s4 = sshll.u32 %s180_s30, 4  ;;  %s173_s5 = scalar_lea.vmem [#allocation4], %s469_s27  ;;  %s182_s4 = int_to_ptr.hbm [resolvable:$true] %s181_s4 }
   0xf   : > { %s183_s6 = sshll.u32 %s173_s5, 4  ;;  %p492_p9 = pnand %p495_p8, %p690_p3  ;;  %s184_s6 = int_to_ptr.vmem [resolvable:$true] %s183_s6 }
  0x10   : > { %p472_p10 = scmp.ge.s32.totalorder %s629_s17, 1  ;;  %p204_p11 = scmp.lt.s32.totalorder %s629_s17, 3 }
  0x11   : > { %s170_s7 = scalar_lea.sflag [#allocation5], %s169_s25  ;;  %s631_s8 = smov 128  }
  0x12   : > { %s632_s9 = smov 8   ;;  %p205_p12 = pnand %p472_p10, %p204_p11 }
  0x13   : > { %494 = dma.hbm_to_vmem [thread:$0]  (!%p492_p9), %s182_s4, 256, %s184_s6, %s170_s7, %s631_s8, %s631_s8, %s632_s9  }
  0x14   : > { %208 = sbr.rel (%p205_p12) target bundleno = 301 (0x12d), region = 32  ;;  %s210_s10 = sand.u32 (!%p205_p12), 1, %s613_s13  }
  0x15   : > { %s473_s11 = sshll.u32 (!%p205_p12), %s210_s10, 4  ;;  %s211_s12 = scalar_lea.sflag (!%p205_p12), [#allocation5], %s210_s10 }
  0x16   : > { %s214_s18 = scalar_lea.vmem (!%p205_p12), [#allocation4], %s473_s11 }
  0x19   : > { %604 = dma.done.wait (%p697_p7), %s211_s12, 256  }
  0x1a   : > { %606 = vsyncadd (%p697_p7), %s211_s12, 4294967040  ;;  %p255_p13 = scmp.lt.s32.totalorder %s621_s15, 1  ;;  %v290_v2 = vld [vmem:[%s214_s18] sm:$0xff]  ;;  %v291_v5 = vld [vmem:[%s214_s18 + $0x8] sm:$0xff]  ;;  %v633_v21 = vmov 0.0   ;;  %vm357_vm6 = vcmask 0  }
  0x1b   : > { %v292_v6 = vmax.f32 %v290_v2, 0.0  ;;  %v293_v7 = vmax.f32 %v291_v5, 0.0 }
  0x1c   : > { %s766_s15 = smov (!%p255_p13, %s621_s15), 1 }
  0x1d   : > { %s481_s20 = sshll.u32 %s766_s15, 4  ;;  %v294_v10 = vmin.f32 %v292_v6, 10.0  ;;  %v295_v12 = vmin.f32 %v293_v7, 10.0  ;;  %s277_s6 = scalar_lea.vmem %s755_s3, %s766_s15 }
  0x1e   : > { %s262_s25 = scalar_lea.vmem %s752_s0, %s481_s20  ;;  %s273_s28 = scalar_lea.vmem %s754_s2, %s481_s20 }
  0x1f   : > { %v284_v0 = vld [vmem:[%s262_s25] sm:$0xff]  ;;  %v285_v1 = vld [vmem:[%s262_s25 + $0x8] sm:$0xff] }
  0x20   : > { %v286_v3 = vmax.f32 %v284_v0, 0.0  ;;  %v287_v4 = vmax.f32 %v285_v1, 0.0  ;;  %v298_v11 = vld [vmem:[%s273_s28] sm:$0xff]  ;;  %v299_v13 = vld [vmem:[%s273_s28 + $0x8] sm:$0xff] }
  0x21   : > { %vm300_vm0 = vcmp.ne.s32.totalorder %v298_v11, 0  ;;  %vm301_vm1 = vcmp.ne.s32.totalorder %v299_v13, 0 }
  0x22   : > { %v288_v8 = vmin.f32 %v286_v3, 10.0  ;;  %v289_v9 = vmin.f32 %v287_v4, 10.0  ;;  %v306_v22 = vsel %vm300_vm0, 1.0, %v633_v21  ;;  %v307_v23 = vsel %vm301_vm1, 1.0, %v633_v21 }
  0x23   : > { %v313_v24 = vadd.f32 %v307_v23, %v306_v22 }
  0x24   : > { %v296_v14 = vsub.f32 %v288_v8, %v294_v10  ;;  %v297_v15 = vsub.f32 %v289_v9, %v295_v12 }
  0x26   : > { %v302_v16 = vmul.f32 %v296_v14, %v296_v14  ;;  %v303_v17 = vmul.f32 %v297_v15, %v297_v15 }
  0x28   : > { %v304_v18 = vsel %vm300_vm0, %v302_v16, 0.0  ;;  %v305_v19 = vsel %vm301_vm1, %v303_v17, 0.0 }
  0x29   : > { %v309_v20 = vadd.f32 %v305_v19, %v304_v18 }
  0x2b   : > { %320 = vadd.xlane.f32.xlu0 %v309_v20 }
  0x33   : > { %330 = vadd.xlane.f32.xlu0 %v313_v24 }
  0x9e   : > { %v321_v25 = vpop.xlane.xlu0 %320 }
  0x9f   : > { %v322_v26 = vrot.slane %v321_v25, 4 }
  0xa1   : > { %v323_v27 = vadd.f32 %v322_v26, %v321_v25 }
  0xa3   : > { %v324_v28 = vrot.slane %v323_v27, 2 }
  0xa5   : > { %v325_v29 = vadd.f32 %v324_v28, %v323_v27 }
  0xa6   : > { %v331_v30 = vpop.xlane.xlu0 %330 }
  0xa7   : > { %v332_v31 = vrot.slane %v331_v30, 4  ;;  %v326_v32 = vrot.slane %v325_v29, 1 }
  0xa9   : > { %v333_v33 = vadd.f32 %v332_v31, %v331_v30  ;;  %v327_v34 = vadd.f32 %v326_v32, %v325_v29 }
  0xab   : > { %v334_v35 = vrot.slane %v333_v33, 2  ;;  %483 = vpush %v327_v34 }
  0xad   : > { %v335_v36 = vadd.f32 %v334_v35, %v333_v33 }
  0xaf   : > { %v336_v37 = vrot.slane %v335_v36, 1 }
  0xb1   : > { %v337_v38 = vadd.f32 %v336_v37, %v335_v36 }
  0xb3   : > { %485 = vpush %v337_v38 }
  0xdc   : > { %s484_s23 = spop %483 }
  0xe4   : > { %s486_s29 = spop %485 }
  0xe5   : > { %v339_v39 = vstv %s486_s29 }
  0xe6   : > { %547 = vrcp.f32 %v339_v39  ;;  %v351_v43 = vand.u32 2147483648, %v339_v39  ;;  %v349_v45 = vand.u32 2147483647, %v339_v39  ;;  %vm345_vm3 = vweird.f32 %v339_v39 }
  0xe8   : > { %v352_v47 = vor.u32 1.1754944e-38, %v351_v43  ;;  %vm350_vm5 = vcmp.eq.f32.partialorder %v349_v45, 8.507059e+37 }
  0xec   : > { %v548_v40 = vpop.eup %547 }
  0xed   : > { %v341_v41 = vmul.f32 %v548_v40, %v339_v39  ;;  %vm346_vm2 = vweird.f32 %v548_v40 }
  0xee   : > { %vm347_vm4 = vmor %vm345_vm3, %vm346_vm2 }
  0xef   : > { %v342_v42 = vsub.f32 1.0, %v341_v41 }
  0xf1   : > { %v343_v44 = vmul.f32 %v548_v40, %v342_v42 }
  0xf3   : > { %v344_v46 = vadd.f32 %v548_v40, %v343_v44 }
  0xf5   : > { %v348_v48 = vsel %vm347_vm4, %v548_v40, %v344_v46 }
  0xf6   : > { %v353_v49 = vsel %vm350_vm5, %v352_v47, %v348_v48 }
  0xf7   : > { %487 = vpush %v353_v49 }
 0x128   : > { %s488_s30 = spop %487 }
 0x129   : > { %s355_s7 = smul.f32 %s488_s30, %s484_s23 }
 0x12b   : > { %v356_v50 = vstv %s355_s7 }
 0x12c   : > { %358 = vst.msk [vmem:[%s277_s6] sm:$0x1] %vm357_vm6, %v356_v50 }
 0x12d PF: > { %s16_s17 = sadd.s32 1, %s629_s17   ;;  %s758_s12 = smov %s613_s13 }
 0x12e   : > { %p13_p0 = scmp.ge.s32.totalorder %s16_s17, 4   ;;  %s759_s13 = smov %s617_s14 }
 0x12f   : > { %s760_s14 = smov %s703_s24  ;;  %s761_s15 = smov %s625_s16 }
 0x130   : > { %s762_s16 = smov %s764_s19  ;;  %15 = sbr.rel (!%p13_p0) target bundleno = 4 (0x4), region = 86 }
 0x135   :  { %376 = vsyncpa [#allocation5], 1 }
 0x136   :  { %378 = vsyncpa [#allocation5 + $0x1], 1 }

</bundles_post_ra>
